<compile_context>
chip_gen: v6e
topology: v6e:2x2x1
jax: 0.10.0
libtpu: 0.0.40
codegen_flags: <defaults>
</compile_context>

<pallas_src>
import jax
import jax.numpy as jnp
from jax.experimental import pallas as pl
from jax.experimental.pallas import tpu as pltpu

EPS = 1e-5


def configurable_block_kernel(x_ref, w_ref, b_ref, gamma_ref, beta_ref, o_ref):
    tn = o_ref.shape[-1]                       # feature-tile width (multiple of 128)

    x = x_ref[...]                             # [B, IN]  (resident across the grid)

    # ---- single fused GEMM: [main Linear | residual projection] ----
    fused = jnp.dot(x, w_ref[...], preferred_element_type=jnp.float32) + b_ref[...]  # [B, 2*TN]
    out = fused[:, :tn]                        # main-path pre-BN activations
    residual = fused[:, tn:]                   # projected residual

    # ---- BatchNorm1d (training mode: batch mean, biased batch var), gamma folded in ----
    mean = jnp.mean(out, axis=0, keepdims=True)            # [1, TN]
    diff = out - mean
    var = jnp.mean(diff * diff, axis=0, keepdims=True)     # biased variance, [1, TN]
    scale = jax.lax.rsqrt(var + EPS) * gamma_ref[...]      # [1, TN]  (inv_std * gamma)

    # ---- ReLU + residual add ----
    out_act = jnp.maximum(diff * scale + beta_ref[...], 0.0)
    o_ref[...] = (out_act + residual).astype(o_ref.dtype)


def configurable_block(x, w, b, pw, pb, gamma, beta, *, tn=128):
    B, IN = x.shape
    OUT = w.shape[1]

    out_pad = pl.cdiv(OUT, tn) * tn
    nt = out_pad // tn
    pad = out_pad - OUT

    def padf(a):  # zero-pad along the feature axis (padded features compute to exactly 0)
        return jnp.pad(a, ((0, 0), (0, pad))) if pad else a

    wp, bp, pwp, pbp, gp, bep = (padf(a) for a in (w, b, pw, pb, gamma, beta))

    # Interleave main / projection weights tile-wise -> each grid step reads one
    # [IN, 2*TN] slab and does a single MXU pass for both paths.
    w_cat = jnp.concatenate(
        [wp.reshape(IN, nt, tn), pwp.reshape(IN, nt, tn)], axis=2
    ).reshape(IN, nt * 2 * tn)
    b_cat = jnp.concatenate(
        [bp.reshape(1, nt, tn), pbp.reshape(1, nt, tn)], axis=2
    ).reshape(1, nt * 2 * tn)

    cost = pl.CostEstimate(
        flops=2 * B * IN * 2 * out_pad + 8 * B * out_pad,
        transcendentals=out_pad,  # rsqrt per feature
        bytes_accessed=4 * (x.size + w_cat.size + b_cat.size
                            + gp.size + bep.size + B * out_pad),
    )

    out = pl.pallas_call(
        configurable_block_kernel,
        out_shape=jax.ShapeDtypeStruct((B, out_pad), jnp.float32),
        grid=(nt,),
        in_specs=[
            pl.BlockSpec((B, IN), lambda j: (0, 0)),        # x: resident, never batch-tiled
            pl.BlockSpec((IN, 2 * tn), lambda j: (0, j)),   # fused [main | proj] weights
            pl.BlockSpec((1, 2 * tn), lambda j: (0, j)),    # fused biases
            pl.BlockSpec((1, tn), lambda j: (0, j)),        # gamma
            pl.BlockSpec((1, tn), lambda j: (0, j)),        # beta
        ],
        out_specs=pl.BlockSpec((B, tn), lambda j: (0, j)),  # lane-dense (TN % 128 == 0)
        compiler_params=pltpu.CompilerParams(dimension_semantics=("parallel",)),
        cost_estimate=cost,
    )(x, w_cat, b_cat, gp, bep)

    return out[:, :OUT]


def reference(x, w, b, pw, pb, gamma, beta):
    out = x @ w + b
    mean = out.mean(axis=0, keepdims=True)
    var = ((out - mean) ** 2).mean(axis=0, keepdims=True)
    out_norm = (out - mean) / jnp.sqrt(var + EPS) * gamma + beta
    out_act = jnp.maximum(out_norm, 0.0)
    residual = x @ pw + pb
    return out_act + residual


if __name__ == "__main__":
    B, IN, OUT = 8, 16, 32
    key = jax.random.PRNGKey(0)
    kx, kw, kb, kpw, kpb = jax.random.split(key, 5)

    x = jax.random.normal(kx, (B, IN), dtype=jnp.float32)

    # deterministic "PyTorch-like" uniform init for the two Linear layers
    bound = 1.0 / (IN ** 0.5)
    w = jax.random.uniform(kw, (IN, OUT), minval=-bound, maxval=bound, dtype=jnp.float32)
    b = jax.random.uniform(kb, (1, OUT), minval=-bound, maxval=bound, dtype=jnp.float32)
    pw = jax.random.uniform(kpw, (IN, OUT), minval=-bound, maxval=bound, dtype=jnp.float32)
    pb = jax.random.uniform(kpb, (1, OUT), minval=-bound, maxval=bound, dtype=jnp.float32)

    # BatchNorm1d affine params: gamma=1, beta=0 (PyTorch defaults)
    gamma = jnp.ones((1, OUT), dtype=jnp.float32)
    beta = jnp.zeros((1, OUT), dtype=jnp.float32)

    out = configurable_block(x, w, b, pw, pb, gamma, beta)
    jax.block_until_ready(out)

    ref = reference(x, w, b, pw, pb, gamma, beta)
    assert out.shape == (B, OUT)
    assert jnp.allclose(out, ref, atol=1e-4, rtol=1e-4), "mismatch vs reference"

    print("KERNEL_OK")
</pallas_src>

<mosaic_0001>
module attributes {stable_mosaic.version = 11 : i64} {
  func.func @configurable_block_kernel(%arg0: i32, %arg1: memref<8x16xf32, #tpu.memory_space<vmem>>, %arg2: memref<16x256xf32, #tpu.memory_space<vmem>>, %arg3: memref<1x256xf32, #tpu.memory_space<vmem>>, %arg4: memref<1x128xf32, #tpu.memory_space<vmem>>, %arg5: memref<1x128xf32, #tpu.memory_space<vmem>>, %arg6: memref<8x128xf32, #tpu.memory_space<vmem>>) attributes {dimension_semantics = [#tpu.dimension_semantics<parallel>], iteration_bounds = array<i64: 1>, scalar_prefetch = 0 : i64, scratch_operands = 0 : i64, tpu.core_type = #tpu.core_type<tc>, window_params = [{pipeline_mode = #tpu.pipeline_mode<synchronous>, transform_indices = @transform_0, window_bounds = array<i64: 8, 16>}, {transform_indices = @transform_1, window_bounds = array<i64: 16, 256>}, {transform_indices = @transform_2, window_bounds = array<i64: 1, 256>}, {transform_indices = @transform_3, window_bounds = array<i64: 1, 128>}, {transform_indices = @transform_4, window_bounds = array<i64: 1, 128>}, {transform_indices = @transform_5, window_bounds = array<i64: 8, 128>}]} {
    %c0 = arith.constant 0 : index
    %c0_0 = arith.constant 0 : index
    %0 = vector.load %arg1[%c0, %c0_0] : memref<8x16xf32, #tpu.memory_space<vmem>>, vector<8x16xf32>
    %c0_1 = arith.constant 0 : index
    %c0_2 = arith.constant 0 : index
    %1 = vector.load %arg2[%c0_1, %c0_2] : memref<16x256xf32, #tpu.memory_space<vmem>>, vector<16x256xf32>
    %cst = arith.constant dense<0.000000e+00> : vector<8x256xf32>
    %2 = tpu.matmul %0, %1, %cst {dimension_numbers = #tpu.dot_dimension_numbers<[1], [0], [0], [1], [0, 0, 1, 1], [], []>} : vector<8x16xf32>, vector<16x256xf32>, vector<8x256xf32> -> vector<8x256xf32>
    %c0_3 = arith.constant 0 : index
    %c0_4 = arith.constant 0 : index
    %3 = vector.load %arg3[%c0_3, %c0_4] : memref<1x256xf32, #tpu.memory_space<vmem>>, vector<1x256xf32>
    %4 = vector.broadcast %3 : vector<1x256xf32> to vector<8x256xf32>
    %5 = arith.addf %2, %4 : vector<8x256xf32>
    %6 = vector.extract_strided_slice %5 {offsets = [0, 0], sizes = [8, 128], strides = [1, 1]} : vector<8x256xf32> to vector<8x128xf32>
    %7 = vector.extract_strided_slice %5 {offsets = [0, 128], sizes = [8, 128], strides = [1, 1]} : vector<8x256xf32> to vector<8x128xf32>
    %cst_5 = arith.constant dense<0.000000e+00> : vector<128xf32>
    %8 = vector.multi_reduction <add>, %6, %cst_5 [0] : vector<8x128xf32> to vector<128xf32>
    %9 = vector.shape_cast %8 : vector<128xf32> to vector<1x128xf32>
    %cst_6 = arith.constant 8.000000e+00 : f32
    %10 = vector.broadcast %cst_6 : f32 to vector<1x128xf32>
    %11 = arith.divf %9, %10 : vector<1x128xf32>
    %12 = vector.broadcast %11 : vector<1x128xf32> to vector<8x128xf32>
    %13 = arith.subf %6, %12 : vector<8x128xf32>
    %14 = arith.mulf %13, %13 : vector<8x128xf32>
    %cst_7 = arith.constant dense<0.000000e+00> : vector<128xf32>
    %15 = vector.multi_reduction <add>, %14, %cst_7 [0] : vector<8x128xf32> to vector<128xf32>
    %16 = vector.shape_cast %15 : vector<128xf32> to vector<1x128xf32>
    %cst_8 = arith.constant 8.000000e+00 : f32
    %17 = vector.broadcast %cst_8 : f32 to vector<1x128xf32>
    %18 = arith.divf %16, %17 : vector<1x128xf32>
    %cst_9 = arith.constant 9.99999974E-6 : f32
    %19 = vector.broadcast %cst_9 : f32 to vector<1x128xf32>
    %20 = arith.addf %18, %19 : vector<1x128xf32>
    %21 = math.rsqrt %20 : vector<1x128xf32>
    %c0_10 = arith.constant 0 : index
    %c0_11 = arith.constant 0 : index
    %22 = vector.load %arg4[%c0_10, %c0_11] : memref<1x128xf32, #tpu.memory_space<vmem>>, vector<1x128xf32>
    %23 = arith.mulf %21, %22 : vector<1x128xf32>
    %24 = vector.broadcast %23 : vector<1x128xf32> to vector<8x128xf32>
    %25 = arith.mulf %13, %24 : vector<8x128xf32>
    %c0_12 = arith.constant 0 : index
    %c0_13 = arith.constant 0 : index
    %26 = vector.load %arg5[%c0_12, %c0_13] : memref<1x128xf32, #tpu.memory_space<vmem>>, vector<1x128xf32>
    %27 = vector.broadcast %26 : vector<1x128xf32> to vector<8x128xf32>
    %28 = arith.addf %25, %27 : vector<8x128xf32>
    %cst_14 = arith.constant 0.000000e+00 : f32
    %29 = vector.broadcast %cst_14 : f32 to vector<8x128xf32>
    %30 = arith.maximumf %28, %29 : vector<8x128xf32>
    %31 = arith.addf %30, %7 : vector<8x128xf32>
    %c0_15 = arith.constant 0 : index
    %c0_16 = arith.constant 0 : index
    %32 = vector.load %arg6[%c0_15, %c0_16] : memref<8x128xf32, #tpu.memory_space<vmem>>, vector<8x128xf32>
    tpu.vector_store %arg6[%c0_15, %c0_16], %31 {strides = array<i32>} : memref<8x128xf32, #tpu.memory_space<vmem>>, vector<8x128xf32>,
    return
  }
  func.func @transform_0(%arg0: i32) -> (i32, i32) {
    %c0_i32 = arith.constant 0 : i32
    %c0_i32_0 = arith.constant 0 : i32
    %c0_i32_1 = arith.constant 0 : i32
    return %c0_i32, %c0_i32_0 : i32, i32
  }
  func.func @transform_1(%arg0: i32) -> (i32, i32) {
    %c0_i32 = arith.constant 0 : i32
    %c0_i32_0 = arith.constant 0 : i32
    return %c0_i32, %arg0 : i32, i32
  }
  func.func @transform_2(%arg0: i32) -> (i32, i32) {
    %c0_i32 = arith.constant 0 : i32
    %c0_i32_0 = arith.constant 0 : i32
    return %c0_i32, %arg0 : i32, i32
  }
  func.func @transform_3(%arg0: i32) -> (i32, i32) {
    %c0_i32 = arith.constant 0 : i32
    %c0_i32_0 = arith.constant 0 : i32
    return %c0_i32, %arg0 : i32, i32
  }
  func.func @transform_4(%arg0: i32) -> (i32, i32) {
    %c0_i32 = arith.constant 0 : i32
    %c0_i32_0 = arith.constant 0 : i32
    return %c0_i32, %arg0 : i32, i32
  }
  func.func @transform_5(%arg0: i32) -> (i32, i32) {
    %c0_i32 = arith.constant 0 : i32
    %c0_i32_0 = arith.constant 0 : i32
    return %c0_i32, %arg0 : i32, i32
  }
}

</mosaic_0001>

<bundles_post_ra>
// kernel: tpu_custom_call.1
= control target key start
LH: loop header
LB: loop body
LE: loop exit
PB: predicated region body
PF: predicated region fallthrough
CT: control target
= control target key end

     0   :  { %10 = vsyncpa [#allocation3], 0  ;;  %s322_s0 = inlined_call_operand.hbm [shape: f32[8,16], index: 0, kind: input, shape index: {}]   ;;  %s323_s1 = inlined_call_operand.hbm [shape: f32[16,256], index: 1, kind: input, shape index: {}]   ;;  %s324_s2 = inlined_call_operand.vmem [shape: f32[1,256], index: 2, kind: input, shape index: {}]   ;;  %s325_s3 = inlined_call_operand.vmem [shape: f32[1,128], index: 3, kind: input, shape index: {}]   ;;  %s326_s4 = inlined_call_operand.vmem [shape: f32[1,128], index: 4, kind: input, shape index: {}]   ;;  %s327_s5 = inlined_call_operand.hbm [shape: f32[8,128], index: 5, kind: output, shape index: {}]  }
   0x1   :  { %11 = vsyncpa [#allocation6], 0 }
   0x2   :  { %12 = vsyncpa [#allocation4], 0  ;;  %s268_s18 = smov [#allocation2]   ;;  %s269_s20 = smov [#allocation5]  }
   0x3   :  { %s19_s19 = sshll.u32 %s268_s18, 4  ;;  %s28_s21 = sshll.u32 %s269_s20, 4  ;;  %s20_s19 = int_to_ptr.vmem [resolvable:$true] %s19_s19  ;;  %s29_s21 = int_to_ptr.vmem [resolvable:$true] %s28_s21 }
   0x4   :  { %s210_s22 = scalar_lea.vmem %s20_s19, 128  ;;  %p215_p1 = scmp.lt.s32.totalorder %s20_s19, %s20_s19 }
   0x5   :  { %p211_p0 = scmp.ne.s32.totalorder %s20_s19, %s210_s22  ;;  %p216_p2 = scmp.lt.s32.totalorder %s210_s22, %s210_s22 }
   0x7   :  { %p217_p3 = por %p216_p2, %p215_p1 }
   0x9   :  { %p218_p4 = pnand %p217_p3, %p211_p0 }
   0xb   :  { %221 = shalt.err (!%p218_p4)
}
   0xc   :  { %22 = dma.hbm_to_vmem [thread:$0]  %s322_s0, 128, %s20_s19, [#allocation3]  }
   0xd   :  { %s230_s25 = scalar_lea.vmem %s29_s21, 512  ;;  %p235_p6 = scmp.lt.s32.totalorder %s29_s21, %s29_s21 }
   0xe   :  { %p231_p5 = scmp.ne.s32.totalorder %s29_s21, %s230_s25  ;;  %p236_p7 = scmp.lt.s32.totalorder %s230_s25, %s230_s25 }
  0x10   :  { %p237_p8 = por %p236_p7, %p235_p6 }
  0x12   :  { %p238_p9 = pnand %p237_p8, %p231_p5 }
  0x14   :  { %241 = shalt.err (!%p238_p9)
}
  0x15   :  { %s270_s26 = smov 256   ;;  %s271_s27 = smov 16  }
  0x16   :  { %34 = dma.hbm_to_vmem [thread:$0]  %s323_s1, 512, %s29_s21, [#allocation6], %s270_s26, %s270_s26, %s271_s27  }
  0x17   :  { %262 = dma.done.wait [#allocation3], 128  }
  0x18   :  { %263 = vsyncadd [#allocation3], 4294967168 }
  0x19   :  { %264 = dma.done.wait [#allocation6], 512  }
  0x1a   :  { %265 = vsyncadd [#allocation6], 4294966784  ;;  %v272_v0 = vmov 0.0   ;;  %v51_v1 = vld [vmem:[#allocation5 + $0x18] sm:$0xff]  ;;  %v50_v2 = vld [vmem:[#allocation5 + $0x10] sm:$0xff]  ;;  %vm64_vm0 = vcmask 130048   ;;  %v54_v6 = vlaneseq }
  0x1b   :  { %132 = vmatprep.mubr.f32.mxu0 %v272_v0  ;;  %v49_v3 = vld [vmem:[#allocation5 + $0x8] sm:$0xff]  ;;  %96 = vmatprep.subr.mxu0 %v51_v1  ;;  %v48_v4 = vld [vmem:[#allocation5] sm:$0xff]  ;;  %v47_v5 = vld [vmem:[#allocation2] sm:$0xff]  ;;  %s273_s8 = smov [#allocation7]  }
  0x1c   :  { %97 = vmatpush1.msra.mxu0 %v50_v2  ;;  %v55_v7 = vshrl.u32 %v54_v6, 7  ;;  %v52_v9 = vld [vmem:[%s324_s2] sm:$0x3]  ;;  %s182_s9 = sshll.u32 %s273_s8, 4  ;;  %s183_s9 = int_to_ptr.vmem [resolvable:$true] %s182_s9 }
  0x1d   :  { %98 = vmatprep.subr.mxu0 %v49_v3  ;;  %v158_v30 = vld [vmem:[%s325_s3] sm:$0x1]  ;;  %s242_s3 = scalar_lea.vmem %s183_s9, 128  ;;  %p247_p11 = scmp.lt.s32.totalorder %s183_s9, %s183_s9 }
  0x1e   :  { %99 = vmatpush1.msra.mxu0 %v48_v4  ;;  %v56_v8 = vsub.s32 0, %v55_v7  ;;  %v60_v33 = vsub.s32 1, %v55_v7  ;;  %v193_v35 = vld [vmem:[%s326_s4] ss:$0 sm:$0xff]  ;;  %p243_p10 = scmp.ne.s32.totalorder %s183_s9, %s242_s3  ;;  %p248_p12 = scmp.lt.s32.totalorder %s242_s3, %s242_s3 }
  0x1f   :  { %192 = vmatmul.mubr.msk.f32.vlgmr.msra.gmra.mxu0 %vm64_vm0, %v47_v5 }
  0x20   :  { %v57_v10 = vrot.slane %v52_v9, %v56_v8  ;;  %v61_v36 = vrot.slane %v52_v9, %v60_v33  ;;  %p249_p13 = por %p248_p12, %p247_p11 }
  0x22   :  { %p250_p0 = pnand %p249_p13, %p243_p10 }
  0xdf   :  { %v134_v11 = vpop.f32.mrf.mxu0 }
  0xe0   :  { %v135_v12 = vadd.f32 %v134_v11, %v57_v10 }
  0xe1   :  { %v136_v38 = vpop.f32.mrf.mxu0 }
  0xe2   :  { %v139_v13 = vrot.slane %v135_v12, 4  ;;  %v137_v40 = vadd.f32 %v136_v38, %v61_v36 }
  0xe4   :  { %v140_v14 = vadd.f32 %v139_v13, %v135_v12 }
  0xe6   :  { %v141_v15 = vrot.slane %v140_v14, 2 }
  0xe8   :  { %v142_v16 = vadd.f32 %v141_v15, %v140_v14 }
  0xea   :  { %v143_v17 = vrot.slane %v142_v16, 1 }
  0xec   :  { %v144_v18 = vadd.f32 %v143_v17, %v142_v16 }
  0xee   :  { %v146_v19 = vmul.f32 0.125, %v144_v18 }
  0xf0   :  { %v147_v20 = vsub.f32 %v135_v12, %v146_v19 }
  0xf2   :  { %v148_v21 = vmul.f32 %v147_v20, %v147_v20 }
  0xf4   :  { %v149_v22 = vrot.slane %v148_v21, 4 }
  0xf6   :  { %v150_v23 = vadd.f32 %v149_v22, %v148_v21 }
  0xf8   :  { %v151_v24 = vrot.slane %v150_v23, 2 }
  0xfa   :  { %v152_v25 = vadd.f32 %v151_v24, %v150_v23 }
  0xfc   :  { %v153_v26 = vrot.slane %v152_v25, 1 }
  0xfe   :  { %v154_v27 = vadd.f32 %v153_v26, %v152_v25 }
 0x100   :  { %v155_v28 = vmul.f32 0.125, %v154_v27 }
 0x102   :  { %v156_v29 = vadd.f32 1e-05, %v155_v28 }
 0x104   :  { %200 = vrsqrt.f32 %v156_v29 }
 0x111   :  { %v201_v31 = vpop.eup %200 }
 0x112   :  { %v159_v32 = vmul.f32 %v201_v31, %v158_v30 }
 0x114   :  { %v163_v34 = vrot.slane %v159_v32, %v56_v8 }
 0x116   :  { %v164_v37 = vmul.f32 %v163_v34, %v147_v20 }
 0x118   :  { %v172_v39 = vadd.f32 %v193_v35, %v164_v37 }
 0x11a   :  { %v173_v41 = vmax.f32 %v172_v39, 0.0 }
 0x11c   :  { %v174_v42 = vadd.f32 %v173_v41, %v137_v40 }
 0x11e   :  { %175 = vst [vmem:[#allocation7] sm:$0xff] %v174_v42 }
 0x11f   :  { %253 = shalt.err (!%p250_p0)
}
 0x120   :  { %185 = dma.vmem_to_hbm [thread:$0]  %s183_s9, 128, %s327_s5, [#allocation4]  }
 0x121   :  { %266 = dma.done.wait [#allocation4], 128  }
 0x122   :  { %267 = vsyncadd [#allocation4], 4294967168 }
 0x123   :  { %189 = vsyncpa [#allocation3], 1 }
 0x124   :  { %190 = vsyncpa [#allocation6], 1 }
 0x125   :  { %191 = vsyncpa [#allocation4], 1 }

</bundles_post_ra>
